<compile_context>
chip_gen: v6e
topology: v6e:2x2x1
jax: 0.10.0
libtpu: 0.0.40
codegen_flags: <defaults>
</compile_context>

<pallas_src>
import functools

import jax
import jax.numpy as jnp
import numpy as np
from jax import lax
from jax.experimental import pallas as pl
from jax.experimental.pallas import tpu as pltpu


def _ree_compute(prob_ref, s0r_ref, s0i_ref, s1r_ref, s1i_ref, op_ref, d0, d1):
    """Shared body: returns (rho_r, rho_i, loss) as f32 values.

    prob_ref : (N, 1)   f32  raw probabilities (pre-relu, pre-normalization)
    s0r/s0i  : (N, d0)  f32  UNNORMALIZED state0 real/imag planes
    s1r/s1i  : (N, d1)  f32  UNNORMALIZED state1 real/imag planes
    op_ref   : (D, 2D)  f32  packed [Re(op) | Im(op)]   (no transpose needed)
    """
    D = d0 * d1
    f32 = jnp.float32

    s0r = s0r_ref[...]
    s0i = s0i_ref[...]
    s1r = s1r_ref[...]
    s1i = s1i_ref[...]
    n_state = s0r.shape[0]

    # --- probability + state normalization folded into ONE divide -----------
    #   w_k = relu(p_k) / ( sum_j relu(p_j) * ||s0_k||^2 * ||s1_k||^2 )
    # (same zero-sum / zero-norm hazards as the torch reference)
    relu_p = jnp.maximum(prob_ref[...], 0.0)                        # (N, 1)
    norm0 = jnp.sum(s0r * s0r + s0i * s0i, axis=1, keepdims=True)   # (N, 1)
    norm1 = jnp.sum(s1r * s1r + s1i * s1i, axis=1, keepdims=True)   # (N, 1)
    w = relu_p / (norm0 * norm1 * jnp.sum(relu_p))                  # (N, 1)

    # --- in-kernel kron via selector matmuls ---------------------------------
    # psi_raw[k, m*d1+n] = s0[k,m]*s1[k,n]
    #   repeat(s0, d1, lanes) = s0 @ R,  R[m, j] = (j // d1 == m)
    #   tile(s1,  d0, lanes)  = s1 @ T,  T[n, j] = (j %  d1 == n)
    # R/T come from broadcasted_iota + compares (pure VPU, no div/mod, no
    # lane-axis reshape/shuffle), then one tiny MXU call per state.
    col0 = lax.broadcasted_iota(jnp.int32, (d0, D), 1)
    row0 = lax.broadcasted_iota(jnp.int32, (d0, D), 0)
    R = ((col0 >= row0 * d1) & (col0 < (row0 + 1) * d1)).astype(f32)   # (d0, D)

    col1 = lax.broadcasted_iota(jnp.int32, (d1, D), 1)
    row1 = lax.broadcasted_iota(jnp.int32, (d1, D), 0)
    match = col1 == row1
    for m in range(1, d0):                 # static unroll; d0 is tiny
        match = match | (col1 == row1 + m * d1)
    T = match.astype(f32)                                              # (d1, D)

    dims_std = (((1,), (0,)), ((), ()))
    E0 = lax.dot_general(jnp.concatenate([s0r, s0i], axis=0), R, dims_std,
                         preferred_element_type=f32)                   # (2N, D)
    E1 = lax.dot_general(jnp.concatenate([s1r, s1i], axis=0), T, dims_std,
                         preferred_element_type=f32)                   # (2N, D)
    e0r, e0i = E0[:n_state], E0[n_state:]
    e1r, e1i = E1[:n_state], E1[n_state:]

    psi_r = e0r * e1r - e0i * e1i          # (N, D) unnormalized Re(kron)
    psi_i = e0r * e1i + e0i * e1r          # (N, D) unnormalized Im(kron)

    # --- rho = sum_k w_k psi_k psi_k^dagger ----------------------------------
    # Two Gram-form MXU calls (sublane-axis stacking only; no lane concats).
    lhs = jnp.concatenate([psi_r * w, psi_i * w], axis=0)   # (2N, D)
    P = jnp.concatenate([psi_r, psi_i], axis=0)             # (2N, D)
    Q = jnp.concatenate([-psi_i, psi_r], axis=0)            # (2N, D)
    # Contraction over dim 0 of both operands (Gram form).  At these shapes an
    # eventual lhs relayout is a single-vreg vxpose; re-verify with
    # pl.lower_as_mlir before scaling D/N up.
    dims_gram = (((0,), (0,)), ((), ()))
    rho_r = lax.dot_general(lhs, P, dims_gram, preferred_element_type=f32)  # (D, D)
    rho_i = lax.dot_general(lhs, Q, dims_gram, preferred_element_type=f32)  # (D, D)

    # rho Hermitian => Re(Tr(rho @ op)) = sum(rho_r*op_r) + sum(rho_i*op_i),
    # exactly, for any op.  Static lane sub-views of the packed op plane.
    loss = jnp.sum(rho_r * op_ref[:, :D]) + jnp.sum(rho_i * op_ref[:, D:])
    return rho_r, rho_i, loss


def _ree_kernel_with_rho(prob_ref, s0r_ref, s0i_ref, s1r_ref, s1i_ref, op_ref,
                         rho_ref, loss_ref, *, d0, d1):
    """rho_ref: (D, 2D) f32 packed [Re|Im];  loss_ref: (1,1) f32 in SMEM."""
    D = d0 * d1
    rho_r, rho_i, loss = _ree_compute(prob_ref, s0r_ref, s0i_ref,
                                      s1r_ref, s1i_ref, op_ref, d0, d1)
    rho_ref[:, :D] = rho_r
    rho_ref[:, D:] = rho_i
    loss_ref[0, 0] = loss


def _ree_kernel_loss_only(prob_ref, s0r_ref, s0i_ref, s1r_ref, s1i_ref, op_ref,
                          loss_ref, *, d0, d1):
    """loss_ref: (1,1) f32 in SMEM.  No rho HBM writeback."""
    _, _, loss = _ree_compute(prob_ref, s0r_ref, s0i_ref,
                              s1r_ref, s1i_ref, op_ref, d0, d1)
    loss_ref[0, 0] = loss


def pack_expect_op(expect_op):
    """Pack the observable ONCE, outside the per-step forward path.

    Returns the (D, 2D) f32 plane [Re(op) | Im(op)].  No transpose is needed:
    rho is Hermitian by construction, so Re(Tr(rho@op)) is a plain elementwise
    dot with this plane.
    """
    op = jnp.asarray(expect_op)
    return jnp.concatenate([jnp.real(op).astype(jnp.float32),
                            jnp.imag(op).astype(jnp.float32)], axis=1)


@functools.partial(jax.jit, static_argnames=("return_rho",))
def autodiff_ree_forward(state0_real, state0_imag, state1_real, state1_imag,
                         probability, op_packed, return_rho=True):
    """Matches AutodiffREE.forward() with set_expectation_op(op).

    op_packed must come from pack_expect_op(op) (built once per observable).
    Returns (loss, rho_packed) where rho_packed is the (D, 2D) f32 plane
    [Re(rho) | Im(rho)], or (loss, None) when return_rho=False.
    """
    f32 = jnp.float32
    N, d0 = state0_real.shape
    d1 = state1_real.shape[1]
    D = d0 * d1
    assert op_packed.shape == (D, 2 * D)
    # Whole-array VMEM residency (op + rho ~ 16*D^2 bytes) is fine at small D;
    # see TODO(synk) above for the tiled-grid version once D grows.
    assert D <= 1024, "D too large for the single-block kernel; tile rho/op."

    prob = probability.astype(f32).reshape(N, 1)
    ins = (prob,
           state0_real.astype(f32), state0_imag.astype(f32),
           state1_real.astype(f32), state1_imag.astype(f32),
           op_packed.astype(f32))

    vmem = pl.BlockSpec(memory_space=pltpu.MemorySpace.VMEM)
    smem = pl.BlockSpec(memory_space=pltpu.MemorySpace.SMEM)

    if return_rho:
        rho_pack, loss = pl.pallas_call(
            functools.partial(_ree_kernel_with_rho, d0=d0, d1=d1),
            out_shape=(jax.ShapeDtypeStruct((D, 2 * D), f32),
                       jax.ShapeDtypeStruct((1, 1), f32)),
            in_specs=[vmem] * 6,
            out_specs=(vmem, smem),
        )(*ins)
        return loss[0, 0], rho_pack

    loss = pl.pallas_call(
        functools.partial(_ree_kernel_loss_only, d0=d0, d1=d1),
        out_shape=jax.ShapeDtypeStruct((1, 1), f32),
        in_specs=[vmem] * 6,
        out_specs=smem,
    )(*ins)
    return loss[0, 0], None


if __name__ == "__main__":
    # Small shapes consistent with the module: num_state=8, dim0=dim1=4 -> D=16.
    num_state, dim0, dim1 = 8, 4, 4
    D = dim0 * dim1

    key = jax.random.PRNGKey(0)
    k = jax.random.split(key, 7)
    # Deterministic synthetic "Haar-like" initial states (forward re-normalizes).
    state0_real = jax.random.normal(k[0], (num_state, dim0), jnp.float32)
    state0_imag = jax.random.normal(k[1], (num_state, dim0), jnp.float32)
    state1_real = jax.random.normal(k[2], (num_state, dim1), jnp.float32)
    state1_imag = jax.random.normal(k[3], (num_state, dim1), jnp.float32)
    probability = jax.random.uniform(k[4], (num_state,), jnp.float32)
    probability = probability / probability.sum()
    op_r = jax.random.normal(k[5], (D, D), jnp.float32)
    op_i = jax.random.normal(k[6], (D, D), jnp.float32)
    op = op_r + 1j * op_i
    op = (op + op.conj().T) / 2          # Hermitian observable

    # Observable is packed ONCE, outside the per-step forward.
    op_packed = jax.block_until_ready(pack_expect_op(op))

    loss, rho_pack = autodiff_ree_forward(state0_real, state0_imag,
                                          state1_real, state1_imag,
                                          probability, op_packed,
                                          return_rho=True)
    loss_only, _ = autodiff_ree_forward(state0_real, state0_imag,
                                        state1_real, state1_imag,
                                        probability, op_packed,
                                        return_rho=False)
    jax.block_until_ready((loss, rho_pack, loss_only))

    rho = np.asarray(rho_pack[:, :D]) + 1j * np.asarray(rho_pack[:, D:])

    # Pure-numpy reference (complex128) of the torch forward.
    s0 = np.asarray(state0_real, np.float64) + 1j * np.asarray(state0_imag, np.float64)
    s0 = s0 / np.linalg.norm(s0, axis=1, keepdims=True)
    s1 = np.asarray(state1_real, np.float64) + 1j * np.asarray(state1_imag, np.float64)
    s1 = s1 / np.linalg.norm(s1, axis=1, keepdims=True)
    p = np.maximum(np.asarray(probability, np.float64), 0.0)
    p = p / p.sum()
    psi = (s0[:, :, None] * s1[:, None, :]).reshape(num_state, -1)
    rho_ref = np.einsum('k,km,kn->mn', p, psi, psi.conj())
    op_np = np.asarray(op, np.complex128)
    loss_ref = np.real(np.sum(rho_ref.reshape(-1) * op_np.T.reshape(-1)))

    np.testing.assert_allclose(rho, rho_ref, rtol=1e-4, atol=1e-5)
    np.testing.assert_allclose(float(loss), loss_ref, rtol=1e-4, atol=1e-5)
    np.testing.assert_allclose(float(loss_only), loss_ref, rtol=1e-4, atol=1e-5)

    print("KERNEL_OK")
</pallas_src>

<mosaic_0001>
module attributes {stable_mosaic.version = 11 : i64} {
  func.func @_ree_kernel_with_rho(%arg0: memref<8x1xf32, #tpu.memory_space<vmem>>, %arg1: memref<8x4xf32, #tpu.memory_space<vmem>>, %arg2: memref<8x4xf32, #tpu.memory_space<vmem>>, %arg3: memref<8x4xf32, #tpu.memory_space<vmem>>, %arg4: memref<8x4xf32, #tpu.memory_space<vmem>>, %arg5: memref<16x32xf32, #tpu.memory_space<vmem>>, %arg6: memref<16x32xf32, #tpu.memory_space<vmem>>, %arg7: memref<1x1xf32, #tpu.memory_space<smem>>) attributes {dimension_semantics = [], scalar_prefetch = 0 : i64, scratch_operands = 0 : i64, tpu.core_type = #tpu.core_type<tc>} {
    %c0 = arith.constant 0 : index
    %c0_0 = arith.constant 0 : index
    %0 = vector.load %arg1[%c0, %c0_0] : memref<8x4xf32, #tpu.memory_space<vmem>>, vector<8x4xf32>
    %c0_1 = arith.constant 0 : index
    %c0_2 = arith.constant 0 : index
    %1 = vector.load %arg2[%c0_1, %c0_2] : memref<8x4xf32, #tpu.memory_space<vmem>>, vector<8x4xf32>
    %c0_3 = arith.constant 0 : index
    %c0_4 = arith.constant 0 : index
    %2 = vector.load %arg3[%c0_3, %c0_4] : memref<8x4xf32, #tpu.memory_space<vmem>>, vector<8x4xf32>
    %c0_5 = arith.constant 0 : index
    %c0_6 = arith.constant 0 : index
    %3 = vector.load %arg4[%c0_5, %c0_6] : memref<8x4xf32, #tpu.memory_space<vmem>>, vector<8x4xf32>
    %c0_7 = arith.constant 0 : index
    %c0_8 = arith.constant 0 : index
    %4 = vector.load %arg0[%c0_7, %c0_8] : memref<8x1xf32, #tpu.memory_space<vmem>>, vector<8x1xf32>
    %cst = arith.constant 0.000000e+00 : f32
    %5 = vector.broadcast %cst : f32 to vector<8x1xf32>
    %6 = arith.maximumf %4, %5 : vector<8x1xf32>
    %7 = arith.mulf %0, %0 : vector<8x4xf32>
    %8 = arith.mulf %1, %1 : vector<8x4xf32>
    %9 = arith.addf %7, %8 : vector<8x4xf32>
    %cst_9 = arith.constant dense<0.000000e+00> : vector<8xf32>
    %10 = vector.multi_reduction <add>, %9, %cst_9 [1] : vector<8x4xf32> to vector<8xf32>
    %11 = vector.shape_cast %10 : vector<8xf32> to vector<8x1xf32>
    %12 = arith.mulf %2, %2 : vector<8x4xf32>
    %13 = arith.mulf %3, %3 : vector<8x4xf32>
    %14 = arith.addf %12, %13 : vector<8x4xf32>
    %cst_10 = arith.constant dense<0.000000e+00> : vector<8xf32>
    %15 = vector.multi_reduction <add>, %14, %cst_10 [1] : vector<8x4xf32> to vector<8xf32>
    %16 = vector.shape_cast %15 : vector<8xf32> to vector<8x1xf32>
    %17 = arith.mulf %11, %16 : vector<8x1xf32>
    %18 = vector.shape_cast %6 : vector<8x1xf32> to vector<1x8x1xf32>
    %cst_11 = arith.constant dense<0.000000e+00> : vector<1xf32>
    %19 = vector.multi_reduction <add>, %18, %cst_11 [1, 2] : vector<1x8x1xf32> to vector<1xf32>
    %20 = vector.shape_cast %19 : vector<1xf32> to vector<1x1x1xf32>
    %21 = vector.extract %20[0, 0, 0] : f32 from vector<1x1x1xf32>
    %22 = vector.broadcast %21 : f32 to vector<8x1xf32>
    %23 = arith.mulf %17, %22 : vector<8x1xf32>
    %24 = arith.divf %6, %23 : vector<8x1xf32>
    %25 = tpu.iota {dimensions = array<i32: 1>} : vector<4x16xi32>
    %26 = tpu.iota {dimensions = array<i32: 0>} : vector<4x16xi32>
    %c4_i32 = arith.constant 4 : i32
    %27 = vector.broadcast %c4_i32 : i32 to vector<4x16xi32>
    %28 = arith.muli %26, %27 : vector<4x16xi32>
    %29 = arith.cmpi sge, %25, %28 : vector<4x16xi32>
    %c1_i32 = arith.constant 1 : i32
    %30 = vector.broadcast %c1_i32 : i32 to vector<4x16xi32>
    %31 = arith.addi %26, %30 : vector<4x16xi32>
    %c4_i32_12 = arith.constant 4 : i32
    %32 = vector.broadcast %c4_i32_12 : i32 to vector<4x16xi32>
    %33 = arith.muli %31, %32 : vector<4x16xi32>
    %34 = arith.cmpi slt, %25, %33 : vector<4x16xi32>
    %35 = arith.andi %29, %34 : vector<4x16xi1>
    %36 = arith.extui %35 : vector<4x16xi1> to vector<4x16xi32>
    %37 = arith.sitofp %36 : vector<4x16xi32> to vector<4x16xf32>
    %38 = tpu.iota {dimensions = array<i32: 1>} : vector<4x16xi32>
    %39 = tpu.iota {dimensions = array<i32: 0>} : vector<4x16xi32>
    %40 = arith.cmpi eq, %38, %39 : vector<4x16xi32>
    %c4_i32_13 = arith.constant 4 : i32
    %41 = vector.broadcast %c4_i32_13 : i32 to vector<4x16xi32>
    %42 = arith.addi %39, %41 : vector<4x16xi32>
    %43 = arith.cmpi eq, %38, %42 : vector<4x16xi32>
    %44 = arith.ori %40, %43 : vector<4x16xi1>
    %c8_i32 = arith.constant 8 : i32
    %45 = vector.broadcast %c8_i32 : i32 to vector<4x16xi32>
    %46 = arith.addi %39, %45 : vector<4x16xi32>
    %47 = arith.cmpi eq, %38, %46 : vector<4x16xi32>
    %48 = arith.ori %44, %47 : vector<4x16xi1>
    %c12_i32 = arith.constant 12 : i32
    %49 = vector.broadcast %c12_i32 : i32 to vector<4x16xi32>
    %50 = arith.addi %39, %49 : vector<4x16xi32>
    %51 = arith.cmpi eq, %38, %50 : vector<4x16xi32>
    %52 = arith.ori %48, %51 : vector<4x16xi1>
    %53 = arith.extui %52 : vector<4x16xi1> to vector<4x16xi32>
    %54 = arith.sitofp %53 : vector<4x16xi32> to vector<4x16xf32>
    %55 = tpu.concatenate %0, %1 in 0 : vector<8x4xf32>, vector<8x4xf32> -> vector<16x4xf32>
    %cst_14 = arith.constant dense<0.000000e+00> : vector<16x16xf32>
    %56 = tpu.matmul %55, %37, %cst_14 {dimension_numbers = #tpu.dot_dimension_numbers<[1], [0], [0], [1], [0, 0, 1, 1], [], []>} : vector<16x4xf32>, vector<4x16xf32>, vector<16x16xf32> -> vector<16x16xf32>
    %57 = tpu.concatenate %2, %3 in 0 : vector<8x4xf32>, vector<8x4xf32> -> vector<16x4xf32>
    %cst_15 = arith.constant dense<0.000000e+00> : vector<16x16xf32>
    %58 = tpu.matmul %57, %54, %cst_15 {dimension_numbers = #tpu.dot_dimension_numbers<[1], [0], [0], [1], [0, 0, 1, 1], [], []>} : vector<16x4xf32>, vector<4x16xf32>, vector<16x16xf32> -> vector<16x16xf32>
    %59 = vector.extract_strided_slice %56 {offsets = [0, 0], sizes = [8, 16], strides = [1, 1]} : vector<16x16xf32> to vector<8x16xf32>
    %60 = vector.extract_strided_slice %56 {offsets = [8, 0], sizes = [8, 16], strides = [1, 1]} : vector<16x16xf32> to vector<8x16xf32>
    %61 = vector.extract_strided_slice %58 {offsets = [0, 0], sizes = [8, 16], strides = [1, 1]} : vector<16x16xf32> to vector<8x16xf32>
    %62 = vector.extract_strided_slice %58 {offsets = [8, 0], sizes = [8, 16], strides = [1, 1]} : vector<16x16xf32> to vector<8x16xf32>
    %63 = arith.mulf %59, %61 : vector<8x16xf32>
    %64 = arith.mulf %60, %62 : vector<8x16xf32>
    %65 = arith.subf %63, %64 : vector<8x16xf32>
    %66 = arith.mulf %59, %62 : vector<8x16xf32>
    %67 = arith.mulf %60, %61 : vector<8x16xf32>
    %68 = arith.addf %66, %67 : vector<8x16xf32>
    %69 = vector.broadcast %24 : vector<8x1xf32> to vector<8x16xf32>
    %70 = arith.mulf %65, %69 : vector<8x16xf32>
    %71 = vector.broadcast %24 : vector<8x1xf32> to vector<8x16xf32>
    %72 = arith.mulf %68, %71 : vector<8x16xf32>
    %73 = tpu.concatenate %70, %72 in 0 : vector<8x16xf32>, vector<8x16xf32> -> vector<16x16xf32>
    %74 = tpu.concatenate %65, %68 in 0 : vector<8x16xf32>, vector<8x16xf32> -> vector<16x16xf32>
    %cst_16 = arith.constant 0.000000e+00 : f32
    %75 = vector.broadcast %cst_16 : f32 to vector<8x16xf32>
    %76 = arith.subf %75, %68 : vector<8x16xf32>
    %77 = tpu.concatenate %76, %65 in 0 : vector<8x16xf32>, vector<8x16xf32> -> vector<16x16xf32>
    %cst_17 = arith.constant dense<0.000000e+00> : vector<16x16xf32>
    %78 = tpu.matmul %73, %74, %cst_17 {dimension_numbers = #tpu.dot_dimension_numbers<[0], [0], [1], [1], [0, 1, 1, 1], [], []>} : vector<16x16xf32>, vector<16x16xf32>, vector<16x16xf32> -> vector<16x16xf32>
    %cst_18 = arith.constant dense<0.000000e+00> : vector<16x16xf32>
    %79 = tpu.matmul %73, %77, %cst_18 {dimension_numbers = #tpu.dot_dimension_numbers<[0], [0], [1], [1], [0, 1, 1, 1], [], []>} : vector<16x16xf32>, vector<16x16xf32>, vector<16x16xf32> -> vector<16x16xf32>
    %c0_19 = arith.constant 0 : index
    %c0_20 = arith.constant 0 : index
    %80 = vector.load %arg5[%c0_19, %c0_20] : memref<16x32xf32, #tpu.memory_space<vmem>>, vector<16x16xf32>
    %81 = arith.mulf %78, %80 : vector<16x16xf32>
    %82 = vector.shape_cast %81 : vector<16x16xf32> to vector<1x16x16xf32>
    %cst_21 = arith.constant dense<0.000000e+00> : vector<1xf32>
    %83 = vector.multi_reduction <add>, %82, %cst_21 [1, 2] : vector<1x16x16xf32> to vector<1xf32>
    %84 = vector.shape_cast %83 : vector<1xf32> to vector<1x1x1xf32>
    %85 = vector.extract %84[0, 0, 0] : f32 from vector<1x1x1xf32>
    %c0_22 = arith.constant 0 : index
    %c16 = arith.constant 16 : index
    %86 = vector.load %arg5[%c0_22, %c16] : memref<16x32xf32, #tpu.memory_space<vmem>>, vector<16x16xf32>
    %87 = arith.mulf %79, %86 : vector<16x16xf32>
    %88 = vector.shape_cast %87 : vector<16x16xf32> to vector<1x16x16xf32>
    %cst_23 = arith.constant dense<0.000000e+00> : vector<1xf32>
    %89 = vector.multi_reduction <add>, %88, %cst_23 [1, 2] : vector<1x16x16xf32> to vector<1xf32>
    %90 = vector.shape_cast %89 : vector<1xf32> to vector<1x1x1xf32>
    %91 = vector.extract %90[0, 0, 0] : f32 from vector<1x1x1xf32>
    %92 = arith.addf %85, %91 : f32
    %c0_24 = arith.constant 0 : index
    %c0_25 = arith.constant 0 : index
    %93 = vector.load %arg6[%c0_24, %c0_25] : memref<16x32xf32, #tpu.memory_space<vmem>>, vector<16x16xf32>
    tpu.vector_store %arg6[%c0_24, %c0_25], %78 {strides = array<i32>} : memref<16x32xf32, #tpu.memory_space<vmem>>, vector<16x16xf32>,
    %c0_26 = arith.constant 0 : index
    %c16_27 = arith.constant 16 : index
    %94 = vector.load %arg6[%c0_26, %c16_27] : memref<16x32xf32, #tpu.memory_space<vmem>>, vector<16x16xf32>
    tpu.vector_store %arg6[%c0_26, %c16_27], %79 {strides = array<i32>} : memref<16x32xf32, #tpu.memory_space<vmem>>, vector<16x16xf32>,
    %c0_28 = arith.constant 0 : index
    %c0_29 = arith.constant 0 : index
    %95 = memref.load %arg7[%c0_28, %c0_29] : memref<1x1xf32, #tpu.memory_space<smem>>
    memref.store %92, %arg7[%c0_28, %c0_29] : memref<1x1xf32, #tpu.memory_space<smem>>
    return
  }
}

</mosaic_0001>

<bundles_post_ra>
// kernel: autodiff_ree_forward.1
= control target key start
LH: loop header
LB: loop body
LE: loop exit
PB: predicated region body
PF: predicated region fallthrough
CT: control target
= control target key end

     0   :  { %13 = vsyncpa [#allocation3], 0  ;;  %vm47_vm0 = vcmask 7168   ;;  %vm36_vm1 = vcmask 31744   ;;  %v62_v3 = vlaneseq  ;;  %s740_s0 = inlined_call_operand.vmem [shape: f32[8,1], index: 0, kind: input, shape index: {}]   ;;  %s741_s1 = inlined_call_operand.vmem [shape: f32[8,4], index: 1, kind: input, shape index: {}]   ;;  %s742_s2 = inlined_call_operand.vmem [shape: f32[8,4], index: 2, kind: input, shape index: {}]   ;;  %s743_s3 = inlined_call_operand.vmem [shape: f32[8,4], index: 3, kind: input, shape index: {}]   ;;  %s744_s4 = inlined_call_operand.vmem [shape: f32[8,4], index: 4, kind: input, shape index: {}]   ;;  %s745_s5 = inlined_call_operand.vmem [shape: f32[16,32], index: 5, kind: input, shape index: {}]   ;;  %s746_s6 = inlined_call_operand.hbm [shape: f32[16,32], index: 6, kind: output, shape index: {0}]   ;;  %s747_s7 = inlined_call_operand.hbm [shape: f32[1,1], index: 7, kind: output, shape index: {1}]  }
   0x1   :  { %v692_v0 = vld [vmem:[%s740_s0] sm:$0xff] }
   0x2   :  { %v29_v1 = vld [vmem:[%s743_s3] sm:$0xff]  ;;  %v32_v4 = vmax.f32 %v692_v0, 0.0 }
   0x3   :  { %v30_v2 = vld [vmem:[%s744_s4] sm:$0xff]  ;;  %v40_v5 = vmul.f32 %v29_v1, %v29_v1  ;;  %574 = vmatprep.mubr.msk.f32.mxu1 %vm36_vm1, %v29_v1 }
   0x4   :  { %v41_v6 = vmul.f32 %v30_v2, %v30_v2  ;;  %v27_v7 = vld [vmem:[%s741_s1] sm:$0xff] }
   0x5   :  { %v28_v8 = vld [vmem:[%s742_s2] sm:$0xff] }
   0x6   :  { %14 = vsyncpa [#allocation4], 0  ;;  %v33_v9 = vmul.f32 %v27_v7, %v27_v7  ;;  %v34_v10 = vmul.f32 %v28_v8, %v28_v8  ;;  %v63_v11 = vand.u32 127, %v62_v3  ;;  %v65_v12 = vshrl.u32 %v62_v3, 7  ;;  %569 = vmatprep.mubr.msk.f32.mxu0 %vm36_vm1, %v27_v7  ;;  %v458_v55 = vld [vmem:[%s745_s5] sm:$0xff]  ;;  %s643_s4 = smov 112  }
   0x7   :  { %v48_v13 = vsel %vm47_vm0, %v32_v4, 0.0  ;;  %v42_v14 = vadd.f32 %v41_v6, %v40_v5  ;;  %vm92_vm7 = vcmask 1043456   ;;  %v641_v24 = vmov 0.0   ;;  %v459_v57 = vld [vmem:[%s745_s5 + $0x8] sm:$0xff]  ;;  %s644_s5 = smov 16   ;;  %s645_s12 = smov [#allocation2]  }
   0x8   :  { %49 = vadd.xlane.f32.xlu0 %v48_v13  ;;  %v35_v15 = vadd.f32 %v34_v10, %v33_v9  ;;  %v66_v16 = vmul.u32 4, %v65_v12  ;;  %v68_v17 = vadd.s32 1, %v65_v12  ;;  %vm74_vm2 = vcmp.eq.s32.totalorder %v63_v11, %v65_v12  ;;  %s517_s13 = sshll.u32 %s645_s12, 4  ;;  %s518_s13 = int_to_ptr.vmem [resolvable:$true] %s517_s13 }
   0x9   :  { %v43_v18 = vsel %vm36_vm1, %v42_v14, 0.0  ;;  %v75_v19 = vadd.s32 4, %v65_v12  ;;  %v78_v20 = vadd.s32 8, %v65_v12  ;;  %v81_v21 = vadd.s32 12, %v65_v12  ;;  %s609_s14 = scalar_lea.vmem %s518_s13, 256  ;;  %p614_p1 = scmp.lt.s32.totalorder %s518_s13, %s518_s13 }
   0xa   :  { %44 = vadd.xlane.f32.xlu1 %v43_v18  ;;  %v37_v22 = vsel %vm36_vm1, %v35_v15, 0.0  ;;  %vm67_vm3 = vcmp.ge.s32.totalorder %v63_v11, %v66_v16  ;;  %v69_v23 = vmul.u32 4, %v68_v17  ;;  %v642_v27 = vmov 0   ;;  %p610_p0 = scmp.ne.s32.totalorder %s518_s13, %s609_s14  ;;  %p615_p2 = scmp.lt.s32.totalorder %s609_s14, %s609_s14 }
   0xb   :  { %vm76_vm4 = vcmp.eq.s32.totalorder %v63_v11, %v75_v19  ;;  %vm79_vm5 = vcmp.eq.s32.totalorder %v63_v11, %v78_v20  ;;  %vm82_vm9 = vcmp.eq.s32.totalorder %v63_v11, %v81_v21  ;;  %605 = vset.pattern.permute.xlu1 %v642_v27  ;;  %vm301_vm13 = vcmask 130048  }
   0xc   :  { %38 = vadd.xlane.f32.xlu0 %v37_v22  ;;  %vm70_vm6 = vcmp.lt.s32.totalorder %v63_v11, %v69_v23  ;;  %vm77_vm8 = vmor %vm74_vm2, %vm76_vm4  ;;  %vm507_vm14 = vcmask 261248   ;;  %p616_p3 = por %p615_p2, %p614_p1 }
   0xd   :  { %vm71_vm10 = vmand %vm67_vm3, %vm70_vm6 }
   0xe   :  { %v541_v25 = vsel %vm71_vm10, 1.0, %v641_v24  ;;  %vm80_vm11 = vmor %vm77_vm8, %vm79_vm5  ;;  %p617_p4 = pnand %p616_p3, %p610_p0 }
   0xf   :  { %567 = vmatprep.subr.msk.mxu0 %vm92_vm7, %v541_v25  ;;  %vm83_vm12 = vmor %vm80_vm11, %vm82_vm9 }
  0x10   :  { %v542_v26 = vsel %vm83_vm12, 1.0, %v641_v24  ;;  %568 = vmatpush3.msk.msra.mxu0 %vm92_vm7, %v541_v25 }
  0x11   :  { %572 = vmatprep.subr.msk.mxu1 %vm92_vm7, %v542_v26  ;;  %570 = vmatmul.mubr.msk.f32.vlgmr.msra.gmra.mxu0 %vm36_vm1, %v28_v8 }
  0x12   :  { %573 = vmatpush3.msk.msra.mxu1 %vm92_vm7, %v542_v26 }
  0x13   :  { %575 = vmatmul.mubr.msk.f32.vlgmr.msra.gmra.mxu1 %vm36_vm1, %v30_v2 }
  0x91   :  { %v50_v28 = vpop.xlane.xlu0 %49 }
  0x92   :  { %v51_v29 = vrot.slane %v50_v28, 4 }
  0x93   :  { %v45_v35 = vpop.xlane.xlu1 %44 }
  0x94   :  { %v52_v30 = vadd.f32 %v51_v29, %v50_v28 }
  0x95   :  { %v39_v36 = vpop.xlane.xlu0 %38 }
  0x96   :  { %v53_v31 = vrot.slane %v52_v30, 2  ;;  %v46_v37 = vmul.f32 %v45_v35, %v39_v36 }
  0x98   :  { %v54_v32 = vadd.f32 %v53_v31, %v52_v30 }
  0x9a   :  { %v55_v33 = vrot.slane %v54_v32, 1 }
  0x9c   :  { %v56_v34 = vadd.f32 %v55_v33, %v54_v32 }
  0x9e   :  { %591 = vpush %v56_v34 }
  0xcf   :  { %s592_s1 = spop %591 }
  0xd0   :  { %v58_v38 = vstv %s592_s1 }
  0xd1   :  { %v59_v39 = vmul.f32 %v58_v38, %v46_v37  ;;  %v571_v40 = vpop.f32.mrf.mxu0 }
  0xd3   :  { %607 = vrcp.f32 %v59_v39  ;;  %v576_v41 = vpop.f32.mrf.mxu1  ;;  %v162_v42 = vpop.f32.mrf.mxu0 }
  0xd4   :  { %v256_v43 = vmul.f32 %v576_v41, %v571_v40  ;;  %v258_v44 = vmul.f32 %v576_v41, %v162_v42 }
  0xd5   :  { %v246_v45 = vpop.f32.mrf.mxu1 }
  0xd6   :  { %v255_v46 = vmul.f32 %v246_v45, %v162_v42  ;;  %v259_v47 = vmul.f32 %v571_v40, %v246_v45 }
  0xd8   :  { %v257_v48 = vsub.f32 %v255_v46, %v256_v43  ;;  %v260_v49 = vadd.f32 %v259_v47, %v258_v44 }
  0xda   :  { %577 = vmatprep.subr.mxu0 %v260_v49  ;;  %584 = vmatprep.subr.mxu1 %v257_v48  ;;  %v268_v50 = vsub.f32 0.0, %v260_v49 }
  0xdb   :  { %578 = vmatpush3.msra.mxu0 %v260_v49  ;;  %585 = vmatpush3.msra.mxu1 %v257_v48 }
  0xdc   :  { %579 = vmatprep.subr.mxu0 %v257_v48  ;;  %586 = vmatprep.subr.mxu1 %v268_v50 }
  0xdd   :  { %580 = vmatpush3.msra.mxu0 %v257_v48  ;;  %587 = vmatpush3.msra.mxu1 %v268_v50 }
  0xe0   :  { %v608_v51 = vpop.eup %607 }
  0xe1   :  { %v61_v52 = vmul.f32 %v608_v51, %v32_v4 }
  0xe3   :  { %263 = vperm.xlu1 %605, %v61_v52  }
  0xe7   :  { %476 = vrot.lane.b32.xlu1 %v458_v55, %s643_s4 }
  0xeb   :  { %478 = vrot.lane.b32.xlu1 %v459_v57, %s643_s4 }
 0x15e   :  { %v264_v53 = vpop.permute.xlu1 %263 }
 0x15f   :  { %v266_v54 = vmul.f32 %v264_v53, %v257_v48  ;;  %v267_v56 = vmul.f32 %v264_v53, %v260_v49 }
 0x161   :  { %269 = vxpose.xlu0.b32.start [1/2] (short) (narrow) %v266_v54, 16 }
 0x162   :  { %v477_v60 = vpop.permute.xlu1 %476 }
 0x165   :  { %270 = vxpose.xlu0.b32.end [2/2] (short) (narrow) %v267_v56, 16 }
 0x166   :  { %v479_v61 = vpop.permute.xlu1 %478 }
 0x18e   :  { %606 = vset.pattern.permute.xlu0 %v642_v27 }
 0x1dd   :  { %v285_v58 = vpop.trf.xlu0 }
 0x1de   :  { %581 = vmatprep.mubr.msk.f32.mxu0 %vm301_vm13, %v285_v58  ;;  %588 = vmatprep.mubr.msk.f32.mxu1 %vm301_vm13, %v285_v58 }
 0x1e1   :  { %v286_v59 = vpop.trf.xlu0 }
 0x1e2   :  { %582 = vmatmul.mubr.msk.f32.vlgmr.msra.gmra.mxu0 %vm301_vm13, %v286_v59  ;;  %589 = vmatmul.mubr.msk.f32.vlgmr.msra.gmra.mxu1 %vm301_vm13, %v286_v59 }
 0x2a2   :  { %v583_v62 = vpop.f32.mrf.mxu0  ;;  %v590_v63 = vpop.f32.mrf.mxu1 }
 0x2a3   :  { %v461_v0 = vmul.f32 %v583_v62, %v459_v57  ;;  %498 = vst.msk [vmem:[#allocation2 + $0x8] sm:$0xff] %vm301_vm13, %v583_v62  ;;  %v483_v1 = vmul.f32 %v590_v63, %v479_v61 }
 0x2a4   :  { %v374_v2 = vpop.f32.mrf.mxu0  ;;  %v449_v3 = vpop.f32.mrf.mxu1 }
 0x2a5   :  { %v460_v4 = vmul.f32 %v458_v55, %v374_v2  ;;  %497 = vst.msk [vmem:[#allocation2] sm:$0xff] %vm301_vm13, %v374_v2  ;;  %v482_v5 = vmul.f32 %v477_v60, %v449_v3  ;;  %v463_v7 = vsel %vm301_vm13, %v461_v0, 0.0  ;;  %v485_v9 = vsel %vm301_vm13, %v483_v1, 0.0 }
 0x2a7   :  { %v462_v6 = vsel %vm301_vm13, %v460_v4, 0.0  ;;  %v484_v8 = vsel %vm301_vm13, %v482_v5, 0.0 }
 0x2a8   :  { %v464_v10 = vadd.f32 %v463_v7, %v462_v6  ;;  %v486_v11 = vadd.f32 %v485_v9, %v484_v8 }
 0x2aa   :  { %465 = vadd.xlane.f32.xlu1 %v464_v10  ;;  %487 = vadd.xlane.f32.xlu0 %v486_v11 }
 0x2bb   :  { %501 = vrot.lane.b32.xlu1 %v449_v3, %s644_s5 }
 0x2bf   :  { %503 = vrot.lane.b32.xlu1 %v590_v63, %s644_s5 }
 0x333   :  { %v488_v12 = vpop.xlane.xlu0 %487  ;;  %v466_v13 = vpop.xlane.xlu1 %465 }
 0x334   :  { %v489_v14 = vrot.slane %v488_v12, 4  ;;  %v467_v15 = vrot.slane %v466_v13, 4 }
 0x336   :  { %v490_v16 = vadd.f32 %v489_v14, %v488_v12  ;;  %v468_v17 = vadd.f32 %v467_v15, %v466_v13 }
 0x337   :  { %v502_v18 = vpop.permute.xlu1 %501 }
 0x338   :  { %v491_v19 = vrot.slane %v490_v16, 2  ;;  %v469_v20 = vrot.slane %v468_v17, 2  ;;  %508 = vst.msk [vmem:[#allocation2] sm:$0xff] %vm507_vm14, %v502_v18 }
 0x33a   :  { %v492_v21 = vadd.f32 %v491_v19, %v490_v16  ;;  %v470_v22 = vadd.f32 %v469_v20, %v468_v17 }
 0x33b   :  { %v504_v23 = vpop.permute.xlu1 %503 }
 0x33c   :  { %509 = vst.msk [vmem:[#allocation2 + $0x8] sm:$0xff] %vm507_vm14, %v504_v23  ;;  %v471_v24 = vrot.slane %v470_v22, 1  ;;  %v493_v25 = vrot.slane %v492_v21, 1 }
 0x33d   :  { %620 = shalt.err (!%p617_p4)
}
 0x33e   :  { %s646_s15 = smov 128   ;;  %s647_s16 = smov 8   ;;  %v472_v26 = vadd.f32 %v471_v24, %v470_v22  ;;  %v494_v27 = vadd.f32 %v493_v25, %v492_v21 }
 0x33f   :  { %523 = dma.vmem_to_hbm [thread:$0]  %s518_s13, 256, %s746_s6, [#allocation3], %s646_s15, %s646_s15, %s647_s16  }
 0x340   :  { %593 = vpush %v472_v26  ;;  %s648_s22 = smov [#allocation5]  }
 0x341   :  { %595 = vpush %v494_v27 }
 0x371   :  { %s594_s19 = spop %593 }
 0x372   :  { %s596_s20 = spop %595 }
 0x373   :  { %s496_s21 = sadd.f32 %s596_s20, %s594_s19 }
 0x375   :  { %511 = sst [smem:[#allocation5]] %s496_s21 }
 0x376   :  { %531 = dma.smem_to_hbm %s648_s22, 16, %s747_s7, [#allocation4]  }
 0x377   :  { %637 = dma.done.wait [#allocation3], 256  }
 0x378   :  { %638 = vsyncadd [#allocation3], 4294967040 }
 0x379   :  { %639 = dma.done.wait [#allocation4], 16  }
 0x37a   :  { %640 = vsyncadd [#allocation4], 4294967280 }
 0x37b   :  { %538 = sfence }
 0x37c   :  { %539 = vsyncpa [#allocation3], 1 }
 0x37d   :  { %540 = vsyncpa [#allocation4], 1 }

</bundles_post_ra>
